<compile_context>
chip_gen: v6e
topology: v6e:2x2x1
jax: 0.10.0
libtpu: 0.0.40
codegen_flags: <defaults>
</compile_context>

<pallas_src>
import functools

import numpy as np

import jax
import jax.numpy as jnp
from jax.experimental import pallas as pl
from jax.experimental.pallas import tpu as pltpu


def _tap_masks_and_shifts(H, W):
    """Per-tap flattened-lane shift s = oy*W + ox and validity mask over H*W."""
    HW = H * W
    ii = np.arange(HW) // W
    jj = np.arange(HW) % W
    masks = np.zeros((9, HW), np.float32)
    shifts = []
    for t in range(9):
        oy, ox = t // 3 - 1, t % 3 - 1
        valid = (ii + oy >= 0) & (ii + oy < H) & (jj + ox >= 0) & (jj + ox < W)
        masks[t] = valid.astype(np.float32)
        shifts.append(oy * W + ox)
    return jnp.asarray(masks), tuple(shifts)


def _im2col(x, masks, shifts):
    """x: (C, HW) -> (9*C, HW).  Rows [t*C:(t+1)*C] are x shifted by the tap-t
    spatial offset (pltpu.roll along the lane axis) and masked so that any
    wrapped position (i.e. conv zero-padding) contributes zero to the matmul."""
    L = x.shape[-1]
    parts = []
    for t, s in enumerate(shifts):
        xs = x if s == 0 else pltpu.roll(x, shift=(-s) % L, axis=1)
        parts.append(xs * masks[t:t + 1, :])
    return jnp.concatenate(parts, axis=0)


def _gelu_exact(h):
    """GELU with exact-erf semantics (matches nn.GELU() default).  erf via the
    Abramowitz-Stegun 7.1.26 polynomial (|err| < 1.5e-7); exp -> EUP slot."""
    z = h * 0.7071067811865476
    az = jnp.abs(z)
    t = 1.0 / (1.0 + 0.3275911 * az)
    poly = ((((1.061405429 * t - 1.453152027) * t + 1.421413741) * t
             - 0.284496736) * t + 0.254829592) * t
    e = 1.0 - poly * jnp.exp(-az * az)
    erf = jnp.where(z < 0.0, -e, e)
    return 0.5 * h * (1.0 + erf)


def _conv1_stats_kernel(x_ref, w1_ref, b1_ref, mask_ref, mean_ref, m2_ref,
                        *, shifts, HW):
    """conv1 + per-image BN partial stats (mean, mean-subtracted M2)."""
    masks = mask_ref[...]                                      # (9, HW)
    w1 = w1_ref[...]                                           # (Ch, 9*Cin)
    b1 = b1_ref[...]                                           # (Ch, 1)
    inv_hw = 1.0 / HW
    for b in range(x_ref.shape[0]):                            # static, small
        xcol = _im2col(x_ref[b], masks, shifts)                # (9*Cin, HW)
        h = jnp.dot(w1, xcol, preferred_element_type=jnp.float32) + b1
        mu = jnp.sum(h, axis=1, keepdims=True) * inv_hw        # (Ch, 1)
        d = h - mu
        mean_ref[b] = mu
        m2_ref[b] = jnp.sum(d * d, axis=1, keepdims=True)


def _fused_fwd_kernel(x_ref, w1_ref, b1_ref, scale_ref, shift_ref,
                      w2_ref, b2_ref, mask_ref, out_ref, *, shifts):
    """conv1 (recomputed) -> BN affine (batch stats folded into scale/shift) ->
    GELU -> conv2 -> + bias + residual.  No conv1 HBM round trip."""
    masks = mask_ref[...]
    w1 = w1_ref[...]
    b1 = b1_ref[...]
    scale = scale_ref[...]
    shift = shift_ref[...]
    w2 = w2_ref[...]
    b2 = b2_ref[...]
    for b in range(x_ref.shape[0]):
        x = x_ref[b]                                           # (Cin, HW)
        h = jnp.dot(w1, _im2col(x, masks, shifts),
                    preferred_element_type=jnp.float32) + b1   # (Ch, HW)
        h = h * scale + shift                                  # BatchNorm
        h = _gelu_exact(h)
        y = jnp.dot(w2, _im2col(h, masks, shifts),
                    preferred_element_type=jnp.float32)        # (Cin, HW)
        out_ref[b] = y + b2 + x                                # bias + residual


def _pad_axis(a, axis, size):
    extra = size - a.shape[axis]
    if extra == 0:
        return a
    widths = [(0, 0)] * a.ndim
    widths[axis] = (0, extra)
    return jnp.pad(a, widths)


def resconv_forward(x_nchw, params, eps=1e-5):
    """x_nchw: (N, Cin, H, W) float32 (PyTorch NCHW).  Returns NCHW."""
    w1, b1, gamma, beta, w2, b2 = params
    N, Cin, H, W = x_nchw.shape
    Ch = w1.shape[-1]
    HW = H * W
    assert HW % 128 == 0, "H*W must be a multiple of 128 (lane axis)"

    # pad channel counts to f32 sublane multiples (8): full vreg occupancy and
    # tile-aligned sublane concatenation inside the kernels.
    Cp = -(-Cin // 8) * 8
    Hp = -(-Ch // 8) * 8

    f32 = jnp.float32
    x2 = _pad_axis(x_nchw.reshape(N, Cin, HW).astype(f32), 1, Cp)  # (N, Cp, HW)
    w1p = _pad_axis(_pad_axis(w1.astype(f32), 2, Cp), 3, Hp)       # (3,3,Cp,Hp)
    w2p = _pad_axis(_pad_axis(w2.astype(f32), 2, Hp), 3, Cp)       # (3,3,Hp,Cp)
    b1p = _pad_axis(b1.astype(f32), 0, Hp).reshape(Hp, 1)
    b2p = _pad_axis(b2.astype(f32), 0, Cp).reshape(Cp, 1)
    gammap = _pad_axis(gamma.astype(f32), 0, Hp)
    betap = _pad_axis(beta.astype(f32), 0, Hp)

    # taps stacked along the contraction dim: col (dy*3+dx)*Cp + ci == w[dy,dx,ci,:]
    w1s = jnp.transpose(w1p, (3, 0, 1, 2)).reshape(Hp, 9 * Cp)
    w2s = jnp.transpose(w2p, (3, 0, 1, 2)).reshape(Cp, 9 * Hp)
    masks, shifts = _tap_masks_and_shifts(H, W)

    # images per grid step: amortize per-step overhead for large N, but keep
    # >= 2 grid steps (both v7x TensorCores) and small blocks vs 64 MiB VMEM.
    nb = 1
    while (N % (nb * 2) == 0 and N // (nb * 2) >= 2
           and (nb * 2) * max(Cp, Hp) * HW * 4 <= (4 << 20)):
        nb *= 2
    steps = N // nb

    cparams = pltpu.CompilerParams(dimension_semantics=("parallel",),
                                   vmem_limit_bytes=48 * 1024 * 1024)

    # -------- phase 1: conv1 + per-image BN partial stats (no h1 writeback) ---
    k1 = functools.partial(_conv1_stats_kernel, shifts=shifts, HW=HW)
    cost1 = pl.CostEstimate(
        flops=int(N * (2 * 9 * Cp * Hp * HW + 6 * Hp * HW)),
        transcendentals=0,
        bytes_accessed=int(4 * (N * Cp * HW + 2 * N * Hp + 9 * Cp * Hp + 9 * HW)))
    img_mean, img_m2 = pl.pallas_call(
        k1,
        grid=(steps,),
        in_specs=[
            pl.BlockSpec((nb, Cp, HW), lambda n: (n, 0, 0)),   # x block
            pl.BlockSpec((Hp, 9 * Cp), lambda n: (0, 0)),      # stacked w1
            pl.BlockSpec((Hp, 1), lambda n: (0, 0)),           # b1
            pl.BlockSpec((9, HW), lambda n: (0, 0)),           # tap masks
        ],
        out_specs=(
            pl.BlockSpec((nb, Hp, 1), lambda n: (n, 0, 0)),    # per-image mean
            pl.BlockSpec((nb, Hp, 1), lambda n: (n, 0, 0)),    # per-image M2
        ),
        out_shape=(
            jax.ShapeDtypeStruct((N, Hp, 1), f32),
            jax.ShapeDtypeStruct((N, Hp, 1), f32),
        ),
        compiler_params=cparams,
        cost_estimate=cost1,
    )(x2, w1s, b1p, masks)

    # -------- BN batch-stat finalize (stable parallel combine, O(N*Ch)) -------
    mu_i = img_mean[:, :, 0]                                   # (N, Hp)
    m2_i = img_m2[:, :, 0]                                     # (N, Hp)
    mean = jnp.mean(mu_i, axis=0)                              # (Hp,)
    m2 = jnp.sum(m2_i, axis=0) + HW * jnp.sum((mu_i - mean) ** 2, axis=0)
    var = m2 / (N * HW)                                        # biased variance
    inv = jax.lax.rsqrt(var + eps)
    scale = (gammap * inv).reshape(Hp, 1)
    shift = (betap - mean * gammap * inv).reshape(Hp, 1)

    # -------- phase 2: conv1 (recomputed) + BN + GELU + conv2 + residual ------
    k2 = functools.partial(_fused_fwd_kernel, shifts=shifts)
    cost2 = pl.CostEstimate(
        flops=int(N * (4 * 9 * Cp * Hp * HW + 30 * Hp * HW)),
        transcendentals=int(2 * N * Hp * HW),
        bytes_accessed=int(4 * (2 * N * Cp * HW + 2 * 9 * Cp * Hp + 9 * HW)))
    out2 = pl.pallas_call(
        k2,
        grid=(steps,),
        in_specs=[
            pl.BlockSpec((nb, Cp, HW), lambda n: (n, 0, 0)),   # x (conv1 + residual)
            pl.BlockSpec((Hp, 9 * Cp), lambda n: (0, 0)),      # stacked w1
            pl.BlockSpec((Hp, 1), lambda n: (0, 0)),           # b1
            pl.BlockSpec((Hp, 1), lambda n: (0, 0)),           # BN scale
            pl.BlockSpec((Hp, 1), lambda n: (0, 0)),           # BN shift
            pl.BlockSpec((Cp, 9 * Hp), lambda n: (0, 0)),      # stacked w2
            pl.BlockSpec((Cp, 1), lambda n: (0, 0)),           # b2
            pl.BlockSpec((9, HW), lambda n: (0, 0)),           # tap masks
        ],
        out_specs=pl.BlockSpec((nb, Cp, HW), lambda n: (n, 0, 0)),
        out_shape=jax.ShapeDtypeStruct((N, Cp, HW), f32),
        compiler_params=cparams,
        cost_estimate=cost2,
    )(x2, w1s, b1p, scale, shift, w2s, b2p, masks)

    return out2[:, :Cin, :].reshape(N, Cin, H, W)              # drop channel pad


def resconv_ref(x_nchw, params, eps=1e-5):
    """Plain-JAX reference (same semantics) for a correctness check."""
    w1, b1, gamma, beta, w2, b2 = params
    xn = jnp.transpose(x_nchw, (0, 2, 3, 1))
    dn = ('NHWC', 'HWIO', 'NHWC')
    h = jax.lax.conv_general_dilated(xn, w1, (1, 1), 'SAME',
                                     dimension_numbers=dn) + b1
    mean = jnp.mean(h, axis=(0, 1, 2))
    var = jnp.mean((h - mean) ** 2, axis=(0, 1, 2))
    h = (h - mean) * jax.lax.rsqrt(var + eps) * gamma + beta
    h = jax.nn.gelu(h, approximate=False)
    h = jax.lax.conv_general_dilated(h, w2, (1, 1), 'SAME',
                                     dimension_numbers=dn) + b2
    return jnp.transpose(h + xn, (0, 3, 1, 2))


if __name__ == "__main__":
    N, Cin, H, W, Ch = 2, 4, 16, 16, 8  # in_ch=4, hidden_ch=8

    key = jax.random.PRNGKey(0)
    k = jax.random.split(key, 5)

    # Deterministic parameter init (PyTorch-style uniform bounds; BN defaults).
    bound1 = 1.0 / (Cin * 9) ** 0.5
    w1 = jax.random.uniform(k[0], (3, 3, Cin, Ch), jnp.float32, -bound1, bound1)
    b1 = jax.random.uniform(k[1], (Ch,), jnp.float32, -bound1, bound1)
    gamma = jnp.ones((Ch,), jnp.float32)    # BatchNorm2d weight default
    beta = jnp.zeros((Ch,), jnp.float32)    # BatchNorm2d bias default
    bound2 = 1.0 / (Ch * 9) ** 0.5
    w2 = jax.random.uniform(k[2], (3, 3, Ch, Cin), jnp.float32, -bound2, bound2)
    b2 = jax.random.uniform(k[3], (Cin,), jnp.float32, -bound2, bound2)
    params = (w1, b1, gamma, beta, w2, b2)

    x = jax.random.normal(k[4], (N, Cin, H, W), jnp.float32)

    out = resconv_forward(x, params)
    jax.block_until_ready(out)
    assert out.shape == (N, Cin, H, W)

    ref = resconv_ref(x, params)
    err = float(jnp.max(jnp.abs(out - ref)))
    assert err < 2e-3, err

    print("KERNEL_OK")
</pallas_src>

<mosaic_0001>
module attributes {stable_mosaic.version = 11 : i64} {
  func.func @_conv1_stats_kernel(%arg0: i32, %arg1: memref<1x8x256xf32, #tpu.memory_space<vmem>>, %arg2: memref<8x72xf32, #tpu.memory_space<vmem>>, %arg3: memref<8x1xf32, #tpu.memory_space<vmem>>, %arg4: memref<9x256xf32, #tpu.memory_space<vmem>>, %arg5: memref<1x8x1xf32, #tpu.memory_space<vmem>>, %arg6: memref<1x8x1xf32, #tpu.memory_space<vmem>>) attributes {dimension_semantics = [#tpu.dimension_semantics<parallel>], iteration_bounds = array<i64: 2>, scalar_prefetch = 0 : i64, scratch_operands = 0 : i64, tpu.core_type = #tpu.core_type<tc>, window_params = [{transform_indices = @transform_0, window_bounds = array<i64: 1, 8, 256>}, {pipeline_mode = #tpu.pipeline_mode<synchronous>, transform_indices = @transform_1, window_bounds = array<i64: 8, 72>}, {pipeline_mode = #tpu.pipeline_mode<synchronous>, transform_indices = @transform_2, window_bounds = array<i64: 8, 1>}, {pipeline_mode = #tpu.pipeline_mode<synchronous>, transform_indices = @transform_3, window_bounds = array<i64: 9, 256>}, {transform_indices = @transform_4, window_bounds = array<i64: 1, 8, 1>}, {transform_indices = @transform_5, window_bounds = array<i64: 1, 8, 1>}]} {
    %c0 = arith.constant 0 : index
    %c0_0 = arith.constant 0 : index
    %0 = vector.load %arg4[%c0, %c0_0] : memref<9x256xf32, #tpu.memory_space<vmem>>, vector<9x256xf32>
    %c0_1 = arith.constant 0 : index
    %c0_2 = arith.constant 0 : index
    %1 = vector.load %arg2[%c0_1, %c0_2] : memref<8x72xf32, #tpu.memory_space<vmem>>, vector<8x72xf32>
    %c0_3 = arith.constant 0 : index
    %c0_4 = arith.constant 0 : index
    %2 = vector.load %arg3[%c0_3, %c0_4] : memref<8x1xf32, #tpu.memory_space<vmem>>, vector<8x1xf32>
    %c0_5 = arith.constant 0 : index
    %c0_6 = arith.constant 0 : index
    %c0_7 = arith.constant 0 : index
    %3 = vector.load %arg1[%c0_5, %c0_6, %c0_7] : memref<1x8x256xf32, #tpu.memory_space<vmem>>, vector<1x8x256xf32>
    %4 = vector.shape_cast %3 : vector<1x8x256xf32> to vector<8x256xf32>
    %c17_i32 = arith.constant 17 : i32
    %5 = tpu.dynamic_rotate %4 by %c17_i32 dim 1 : vector<8x256xf32>, i32 -> vector<8x256xf32>
    %6 = vector.extract_strided_slice %0 {offsets = [0, 0], sizes = [1, 256], strides = [1, 1]} : vector<9x256xf32> to vector<1x256xf32>
    %7 = vector.broadcast %6 : vector<1x256xf32> to vector<8x256xf32>
    %8 = arith.mulf %5, %7 : vector<8x256xf32>
    %c16_i32 = arith.constant 16 : i32
    %9 = tpu.dynamic_rotate %4 by %c16_i32 dim 1 : vector<8x256xf32>, i32 -> vector<8x256xf32>
    %10 = vector.extract_strided_slice %0 {offsets = [1, 0], sizes = [1, 256], strides = [1, 1]} : vector<9x256xf32> to vector<1x256xf32>
    %11 = vector.broadcast %10 : vector<1x256xf32> to vector<8x256xf32>
    %12 = arith.mulf %9, %11 : vector<8x256xf32>
    %c15_i32 = arith.constant 15 : i32
    %13 = tpu.dynamic_rotate %4 by %c15_i32 dim 1 : vector<8x256xf32>, i32 -> vector<8x256xf32>
    %14 = vector.extract_strided_slice %0 {offsets = [2, 0], sizes = [1, 256], strides = [1, 1]} : vector<9x256xf32> to vector<1x256xf32>
    %15 = vector.broadcast %14 : vector<1x256xf32> to vector<8x256xf32>
    %16 = arith.mulf %13, %15 : vector<8x256xf32>
    %c1_i32 = arith.constant 1 : i32
    %17 = tpu.dynamic_rotate %4 by %c1_i32 dim 1 : vector<8x256xf32>, i32 -> vector<8x256xf32>
    %18 = vector.extract_strided_slice %0 {offsets = [3, 0], sizes = [1, 256], strides = [1, 1]} : vector<9x256xf32> to vector<1x256xf32>
    %19 = vector.broadcast %18 : vector<1x256xf32> to vector<8x256xf32>
    %20 = arith.mulf %17, %19 : vector<8x256xf32>
    %21 = vector.extract_strided_slice %0 {offsets = [4, 0], sizes = [1, 256], strides = [1, 1]} : vector<9x256xf32> to vector<1x256xf32>
    %22 = vector.broadcast %21 : vector<1x256xf32> to vector<8x256xf32>
    %23 = arith.mulf %4, %22 : vector<8x256xf32>
    %c255_i32 = arith.constant 255 : i32
    %24 = tpu.dynamic_rotate %4 by %c255_i32 dim 1 : vector<8x256xf32>, i32 -> vector<8x256xf32>
    %25 = vector.extract_strided_slice %0 {offsets = [5, 0], sizes = [1, 256], strides = [1, 1]} : vector<9x256xf32> to vector<1x256xf32>
    %26 = vector.broadcast %25 : vector<1x256xf32> to vector<8x256xf32>
    %27 = arith.mulf %24, %26 : vector<8x256xf32>
    %c241_i32 = arith.constant 241 : i32
    %28 = tpu.dynamic_rotate %4 by %c241_i32 dim 1 : vector<8x256xf32>, i32 -> vector<8x256xf32>
    %29 = vector.extract_strided_slice %0 {offsets = [6, 0], sizes = [1, 256], strides = [1, 1]} : vector<9x256xf32> to vector<1x256xf32>
    %30 = vector.broadcast %29 : vector<1x256xf32> to vector<8x256xf32>
    %31 = arith.mulf %28, %30 : vector<8x256xf32>
    %c240_i32 = arith.constant 240 : i32
    %32 = tpu.dynamic_rotate %4 by %c240_i32 dim 1 : vector<8x256xf32>, i32 -> vector<8x256xf32>
    %33 = vector.extract_strided_slice %0 {offsets = [7, 0], sizes = [1, 256], strides = [1, 1]} : vector<9x256xf32> to vector<1x256xf32>
    %34 = vector.broadcast %33 : vector<1x256xf32> to vector<8x256xf32>
    %35 = arith.mulf %32, %34 : vector<8x256xf32>
    %c239_i32 = arith.constant 239 : i32
    %36 = tpu.dynamic_rotate %4 by %c239_i32 dim 1 : vector<8x256xf32>, i32 -> vector<8x256xf32>
    %37 = vector.extract_strided_slice %0 {offsets = [8, 0], sizes = [1, 256], strides = [1, 1]} : vector<9x256xf32> to vector<1x256xf32>
    %38 = vector.broadcast %37 : vector<1x256xf32> to vector<8x256xf32>
    %39 = arith.mulf %36, %38 : vector<8x256xf32>
    %40 = tpu.concatenate %8, %12, %16, %20, %23, %27, %31, %35, %39 in 0 : vector<8x256xf32>, vector<8x256xf32>, vector<8x256xf32>, vector<8x256xf32>, vector<8x256xf32>, vector<8x256xf32>, vector<8x256xf32>, vector<8x256xf32>, vector<8x256xf32> -> vector<72x256xf32>
    %cst = arith.constant dense<0.000000e+00> : vector<8x256xf32>
    %41 = tpu.matmul %1, %40, %cst {dimension_numbers = #tpu.dot_dimension_numbers<[1], [0], [0], [1], [0, 0, 1, 1], [], []>} : vector<8x72xf32>, vector<72x256xf32>, vector<8x256xf32> -> vector<8x256xf32>
    %42 = vector.broadcast %2 : vector<8x1xf32> to vector<8x256xf32>
    %43 = arith.addf %41, %42 : vector<8x256xf32>
    %cst_8 = arith.constant dense<0.000000e+00> : vector<8xf32>
    %44 = vector.multi_reduction <add>, %43, %cst_8 [1] : vector<8x256xf32> to vector<8xf32>
    %45 = vector.shape_cast %44 : vector<8xf32> to vector<8x1xf32>
    %cst_9 = arith.constant 3.906250e-03 : f32
    %46 = vector.broadcast %cst_9 : f32 to vector<8x1xf32>
    %47 = arith.mulf %45, %46 : vector<8x1xf32>
    %48 = vector.broadcast %47 : vector<8x1xf32> to vector<8x256xf32>
    %49 = arith.subf %43, %48 : vector<8x256xf32>
    %c0_10 = arith.constant 0 : index
    %c0_11 = arith.constant 0 : index
    %c0_12 = arith.constant 0 : index
    %50 = vector.load %arg5[%c0_10, %c0_11, %c0_12] : memref<1x8x1xf32, #tpu.memory_space<vmem>>, vector<1x8x1xf32>
    %51 = vector.shape_cast %50 : vector<1x8x1xf32> to vector<8x1xf32>
    %52 = vector.shape_cast %47 : vector<8x1xf32> to vector<1x8x1xf32>
    tpu.vector_store %arg5[%c0_10, %c0_11, %c0_12], %52 {strides = array<i32>} : memref<1x8x1xf32, #tpu.memory_space<vmem>>, vector<1x8x1xf32>,
    %53 = arith.mulf %49, %49 : vector<8x256xf32>
    %cst_13 = arith.constant dense<0.000000e+00> : vector<8xf32>
    %54 = vector.multi_reduction <add>, %53, %cst_13 [1] : vector<8x256xf32> to vector<8xf32>
    %55 = vector.shape_cast %54 : vector<8xf32> to vector<8x1xf32>
    %c0_14 = arith.constant 0 : index
    %c0_15 = arith.constant 0 : index
    %c0_16 = arith.constant 0 : index
    %56 = vector.load %arg6[%c0_14, %c0_15, %c0_16] : memref<1x8x1xf32, #tpu.memory_space<vmem>>, vector<1x8x1xf32>
    %57 = vector.shape_cast %56 : vector<1x8x1xf32> to vector<8x1xf32>
    %58 = vector.shape_cast %55 : vector<8x1xf32> to vector<1x8x1xf32>
    tpu.vector_store %arg6[%c0_14, %c0_15, %c0_16], %58 {strides = array<i32>} : memref<1x8x1xf32, #tpu.memory_space<vmem>>, vector<1x8x1xf32>,
    return
  }
  func.func @transform_0(%arg0: i32) -> (i32, i32, i32) {
    %c0_i32 = arith.constant 0 : i32
    %c0_i32_0 = arith.constant 0 : i32
    %c0_i32_1 = arith.constant 0 : i32
    return %arg0, %c0_i32, %c0_i32_0 : i32, i32, i32
  }
  func.func @transform_1(%arg0: i32) -> (i32, i32) {
    %c0_i32 = arith.constant 0 : i32
    %c0_i32_0 = arith.constant 0 : i32
    %c0_i32_1 = arith.constant 0 : i32
    return %c0_i32, %c0_i32_0 : i32, i32
  }
  func.func @transform_2(%arg0: i32) -> (i32, i32) {
    %c0_i32 = arith.constant 0 : i32
    %c0_i32_0 = arith.constant 0 : i32
    %c0_i32_1 = arith.constant 0 : i32
    return %c0_i32, %c0_i32_0 : i32, i32
  }
  func.func @transform_3(%arg0: i32) -> (i32, i32) {
    %c0_i32 = arith.constant 0 : i32
    %c0_i32_0 = arith.constant 0 : i32
    %c0_i32_1 = arith.constant 0 : i32
    return %c0_i32, %c0_i32_0 : i32, i32
  }
  func.func @transform_4(%arg0: i32) -> (i32, i32, i32) {
    %c0_i32 = arith.constant 0 : i32
    %c0_i32_0 = arith.constant 0 : i32
    %c0_i32_1 = arith.constant 0 : i32
    return %arg0, %c0_i32, %c0_i32_0 : i32, i32, i32
  }
  func.func @transform_5(%arg0: i32) -> (i32, i32, i32) {
    %c0_i32 = arith.constant 0 : i32
    %c0_i32_0 = arith.constant 0 : i32
    %c0_i32_1 = arith.constant 0 : i32
    return %arg0, %c0_i32, %c0_i32_0 : i32, i32, i32
  }
}

</mosaic_0001>

<bundles_post_ra>
// kernel: tpu_custom_call.1
= control target key start
LH: loop header
LB: loop body
LE: loop exit
PB: predicated region body
PF: predicated region fallthrough
CT: control target
= control target key end

     0   :  { %11 = vsyncpa [#allocation3], 0  ;;  %s1038_s0 = inlined_call_operand.hbm [shape: f32[2,8,256], index: 0, kind: input, shape index: {}]   ;;  %s1039_s1 = inlined_call_operand.vmem [shape: f32[8,72], index: 1, kind: input, shape index: {}]   ;;  %s1040_s2 = inlined_call_operand.vmem [shape: f32[8,1], index: 2, kind: input, shape index: {}]   ;;  %s1041_s3 = inlined_call_operand.hbm [shape: f32[9,256], index: 3, kind: input, shape index: {}]   ;;  %s1042_s4 = inlined_call_operand.vmem [shape: f32[2,8,1], index: 4, kind: output, shape index: {0}]   ;;  %s1043_s5 = inlined_call_operand.vmem [shape: f32[2,8,1], index: 5, kind: output, shape index: {1}]  }
   0x1   :  { %13 = vsyncpa [#allocation3 + $0x1], 0 }
   0x2   :  { %14 = vsyncpa [#allocation5], 0  ;;  %s842_s18 = smov 0   ;;  %s844_s19 = smov 0  }
   0x3   :  { %s846_s20 = smov 0   ;;  %s848_s21 = smov 0  }
   0x4 LB: > { %s861_s22 = sadd.s32 4294967295, %s796_s21   ;;  %p40_p0 = scmp.ne.s32.totalorder %s788_s19, %s784_s18  ;;  %s796_s21 = sphi %s848_s21, %s1058_s21   ;;  %s792_s20 = sphi %s846_s20, %s1057_s20   ;;  %s788_s19 = sphi %s844_s19, %s1056_s19   ;;  %s784_s18 = sphi %s842_s18, %s1055_s18  }
   0x5   : > { %p1044_p1 = scmp.eq.s32.totalorder %s861_s22, 0  ;;  %p624_p2 = scmp.ge.s32.totalorder %s796_s21, 1 }
   0x6   : > { %p166_p3 = scmp.lt.s32.totalorder %s796_s21, 3  ;;  %s798_s25 = smov [#allocation4]  }
   0x7   : > { %p869_p4 = por %p1044_p1, %p40_p0  ;;  %s184_s26 = sshll.u32 %s798_s25, 4  ;;  %s185_s26 = int_to_ptr.vmem [resolvable:$true] %s184_s26 }
   0x8   : > { %p873_p5 = pnand %p624_p2, %p166_p3  ;;  %s886_s28 = sadd.s32 1, %s796_s21  }
   0x9   : > { %s1047_s23 = scalar_select %p869_p4, 1, 0 }
   0xa   : > { %s1048_s24 = scalar_select %p873_p5, 1, 0 }
   0xb   : > { %p647_p6 = pneg %p873_p5  ;;  %s27_s29 = sadd.s32 1, %s792_s20 }
   0xc   : > { %s24_s30 = ssub.s32 %s796_s21, %s886_s28  ;;  %s715_s6 = scalar_lea.vmem %s185_s26, 512 }
   0xd   : > { %p881_p7 = pnand %p647_p6, %p1044_p1  ;;  %p716_p9 = scmp.ne.s32.totalorder %s185_s26, %s715_s6 }
   0xe   : > { %p723_p12 = scmp.lt.s32.totalorder %s185_s26, %s185_s26  ;;  %p724_p13 = scmp.lt.s32.totalorder %s715_s6, %s715_s6 }
   0xf   : > { %p706_p8 = pneg %p881_p7 }
  0x10   : > { %p725_p0 = por %p724_p13, %p723_p12 }
  0x11   : > { %p718_p10 = pnand %p716_p9, %p706_p8 }
  0x13   : > { %p719_p11 = pneg %p718_p10 }
  0x15   : > { %p726_p2 = pnand %p725_p0, %p719_p11 }
  0x17   : > { %729 = shalt.err (!%p726_p2)
}
  0x18   : > { %s799_s7 = smov 256   ;;  %s800_s8 = smov 16  }
  0x19   : > { %650 = dma.hbm_to_vmem [thread:$0]  (!%p881_p7), %s1041_s3, 512, %s185_s26, [#allocation5], %s799_s7, %s799_s7, %s800_s8  }
  0x1a   : > { %p25_p3 = scmp.eq.s32.totalorder %s24_s30, 0  ;;  %p34_p6 = scmp.ne.s32.totalorder %s792_s20, %s788_s19 }
  0x1b   : > { %p35_p8 = scmp.eq.s32.totalorder %s796_s21, 0  ;;  %p656_p9 = scmp.lt.s32.totalorder %s796_s21, 2 }
  0x1c   : > { %s903_s11 = scalar_select %p25_p3, %s792_s20, %s27_s29  }
  0x1d   : > { %p36_p10 = por %p35_p8, %p34_p6  ;;  %s198_s12 = sand.u32 1, %s792_s20  }
  0x1e   : > { %s627_s13 = sshll.u32 %s198_s12, 4  ;;  %s640_s14 = sshll.u32 %s796_s21, 8 }
  0x1f   : > { %s910_s17 = scalar_lea.hbm %s1038_s0, %s640_s14  ;;  %s202_s18 = scalar_lea.vmem [#allocation2], %s627_s13 }
  0x20   : > { %s210_s25 = sshll.u32 %s202_s18, 4  ;;  %p912_p7 = pnand %p656_p9, %p36_p10  ;;  %s211_s25 = int_to_ptr.vmem [resolvable:$true] %s210_s25 }
  0x21   : > { %s199_s27 = scalar_lea.sflag [#allocation3], %s198_s12  ;;  %s730_s29 = scalar_lea.hbm %s910_s17, 256 }
  0x22   : > { %p731_p11 = scmp.ne.s32.totalorder %s910_s17, %s730_s29  ;;  %p732_p12 = pneg %p912_p7 }
  0x23   : > { %s735_s6 = scalar_lea.hbm %s1038_s0, 512  ;;  %p736_p2 = scmp.lt.s32.totalorder %s910_s17, %s1038_s0 }
  0x24   : > { %p733_p13 = pnand %p732_p12, %p731_p11  ;;  %p737_p3 = scmp.lt.s32.totalorder %s735_s6, %s730_s29 }
  0x26   : > { %p734_p0 = pneg %p733_p13  ;;  %p738_p6 = por %p737_p3, %p736_p2 }
  0x28   : > { %p739_p8 = pnand %p738_p6, %p734_p0 }
  0x2a   : > { %742 = shalt.err (!%p739_p8)
}
  0x2b   : > { %s743_s9 = scalar_lea.vmem %s211_s25, 256  ;;  %s801_s10 = smov [#allocation2]  }
  0x2c   : > { %p744_p9 = scmp.ne.s32.totalorder %s211_s25, %s743_s9  ;;  %s748_s12 = sshll.u32 %s801_s10, 4  ;;  %s749_s12 = int_to_ptr.vmem [resolvable:$false] %s748_s12 }
  0x2d   : > { %s750_s13 = scalar_lea.vmem %s749_s12, 512  ;;  %p751_p11 = scmp.lt.s32.totalorder %s211_s25, %s749_s12 }
  0x2e   : > { %p746_p10 = pnand %p744_p9, %p732_p12  ;;  %p752_p13 = scmp.lt.s32.totalorder %s750_s13, %s743_s9 }
  0x30   : > { %p747_p1 = pneg %p746_p10  ;;  %p753_p4 = por %p752_p13, %p751_p11 }
  0x32   : > { %p754_p5 = pnand %p753_p4, %p747_p1 }
  0x34   : > { %757 = shalt.err (!%p754_p5)
}
  0x35   : > { %654 = dma.hbm_to_vmem [thread:$0]  (!%p912_p7), %s910_s17, 256, %s211_s25, %s199_s27  }
  0x36   : > { %p1051_p0 = scmp.ne.s32.totalorder %s1048_s24, 0 }
  0x37   : > { %s221_s14 = sand.u32 (!%p1051_p0), 1, %s788_s19   ;;  %p1052_p12 = scmp.ne.s32.totalorder (!%p1051_p0), %s1047_s23, 0 }
  0x38   : > { %219 = sbr.rel (%p1051_p0) target bundleno = 698 (0x2ba), region = 36  ;;  %s631_s15 = sshll.u32 (!%p1051_p0), %s221_s14, 4 }
  0x39   : > { %s222_s16 = scalar_lea.sflag (!%p1051_p0), [#allocation3], %s221_s14  ;;  %s225_s18 = scalar_lea.vmem (!%p1051_p0), [#allocation2], %s631_s15 }
  0x3d   : > { %775 = dma.done.wait (%p1052_p12), %s222_s16, 256  }
  0x3e   : > { %777 = vsyncadd (%p1052_p12), %s222_s16, 4294967040  ;;  %p1053_p1 = scmp.eq.s32.totalorder %s861_s22, 0 }
  0x40   : > { %779 = dma.done.wait (%p1053_p1), [#allocation5], 512   ;;  %p1054_p4 = pmov %p1053_p1 }
  0x41   : > { %v941_v0 = vld [vmem:[%s225_s18] sm:$0xff]  ;;  %s802_s24 = smov 112   ;;  %s803_s17 = smov 111   ;;  %v945_v1 = vld [vmem:[%s225_s18 + $0x8] sm:$0xff]  ;;  %v807_v2 = vmov 0.0   ;;  %v809_v3 = vmov 0   ;;  %v279_v5 = vlaneseq }
  0x42   : > { %781 = vsyncadd (%p1054_p4), [#allocation5], 4294966784  ;;  %389 = vrot.lane.b32.xlu1 %v941_v0, %s802_s24  ;;  %406 = vrot.lane.b32.xlu0 %v941_v0, %s803_s17  ;;  %s804_s23 = smov 113   ;;  %s805_s25 = smov 127   ;;  %v272_v4 = vld [vmem:[%s1040_s2] sm:$0xff]  ;;  %v971_v12 = vld [vmem:[#allocation4 + $0x8] sm:$0xff] }
  0x43   : > { %s806_s26 = smov 1   ;;  %496 = vmatprep.mubr.f32.mxu0 %v807_v2  ;;  %s808_s27 = smov 15   ;;  %703 = vset.pattern.permute.xlu0 %v809_v3  ;;  %v964_v6 = vshrl.u32 %v279_v5, 7  ;;  %v966_v7 = vand.u32 127, %v279_v5  ;;  %v969_v11 = vld [vmem:[#allocation4] sm:$0xff]  ;;  %vm428_vm8 = vcmask 588800  }
  0x44   : > { %s810_s29 = smov 16   ;;  %s811_s21 = smov 17   ;;  %v636_v14 = vld [vmem:[#allocation4 + $0x18] ss:$0 sm:$0xff]  ;;  %v635_v15 = vld [vmem:[#allocation4 + $0x10] ss:$0 sm:$0xff] }
  0x45   : > { %v398_v10 = vsub.s32 7, %v964_v6  ;;  %v381_v13 = vsub.s32 6, %v964_v6  ;;  %vm393_vm0 = vcmp.lt.s32.totalorder %v966_v7, 112  ;;  %vm410_vm1 = vcmp.lt.s32.totalorder %v966_v7, 111  ;;  %p259_p5 = scmp.lt.s32.totalorder %s861_s22, 1 }
  0x46   : > { %391 = vrot.lane.b32.xlu1 %v945_v1, %s802_s24  ;;  %408 = vrot.lane.b32.xlu0 %v945_v1, %s803_s17  ;;  %vm376_vm2 = vcmp.lt.s32.totalorder %v966_v7, 113  ;;  %v364_v20 = vsub.s32 5, %v964_v6  ;;  %v347_v21 = vsub.s32 4, %v964_v6  ;;  %vm359_vm3 = vcmp.lt.s32.totalorder %v966_v7, 127 }
  0x47   : > { %v399_v17 = vrot.slane %v969_v11, %v398_v10  ;;  %v403_v18 = vrot.slane %v971_v12, %v398_v10  ;;  %v382_v24 = vrot.slane %v969_v11, %v381_v13  ;;  %v386_v27 = vrot.slane %v971_v12, %v381_v13  ;;  %s1060_s22 = smov (!%p259_p5, %s861_s22), 1 }
  0x48   : > { %v365_v33 = vrot.slane %v969_v11, %v364_v20  ;;  %v337_v37 = vsub.s32 3, %v964_v6  ;;  %v369_v40 = vrot.slane %v971_v12, %v364_v20  ;;  %v352_v41 = vrot.slane %v971_v12, %v347_v21  ;;  %s633_s9 = sshll.u32 %s1060_s22, 3 }
  0x49   : > { %v348_v42 = vrot.slane %v969_v11, %v347_v21  ;;  %vm332_vm4 = vcmp.lt.s32.totalorder %v966_v7, 1  ;;  %v320_v52 = vsub.s32 2, %v964_v6  ;;  %vm315_vm5 = vcmp.lt.s32.totalorder %v966_v7, 15  ;;  %s262_s13 = scalar_lea.vmem %s1042_s4, %s633_s9  ;;  %s266_s16 = scalar_lea.vmem %s1043_s5, %s633_s9 }
  0x4a   : > { %374 = vrot.lane.b32.xlu1 %v945_v1, %s804_s23  ;;  %372 = vrot.lane.b32.xlu0 %v941_v0, %s804_s23  ;;  %v338_v47 = vrot.slane %v969_v11, %v337_v37  ;;  %v342_v48 = vrot.slane %v971_v12, %v337_v37  ;;  %v354_v51 = vmul.f32 %v352_v41, %v945_v1  ;;  %v303_v58 = vsub.s32 1, %v964_v6 }
  0x4b   : > { %v353_v53 = vmul.f32 %v348_v42, %v941_v0  ;;  %v321_v61 = vrot.slane %v969_v11, %v320_v52  ;;  %v325_v62 = vrot.slane %v971_v12, %v320_v52  ;;  %vm298_vm6 = vcmp.lt.s32.totalorder %v966_v7, 16 }
  0x4c   : > { %v304_v3 = vrot.slane %v969_v11, %v303_v58  ;;  %vm281_vm7 = vcmp.lt.s32.totalorder %v966_v7, 17  ;;  %v271_v7 = vld [vmem:[%s1039_s1] sm:$0xff]  ;;  %vm509_vm9 = vcmask 7168  }
  0x4e   : > { %357 = vrot.lane.b32.xlu1 %v945_v1, %s805_s25  ;;  %355 = vrot.lane.b32.xlu0 %v941_v0, %s805_s25 }
  0x52   : > { %330 = vrot.lane.b32.xlu1 %v945_v1, %s806_s26  ;;  %328 = vrot.lane.b32.xlu0 %v941_v0, %s806_s26 }
  0x56   : > { %313 = vrot.lane.b32.xlu1 %v945_v1, %s808_s27  ;;  %311 = vrot.lane.b32.xlu0 %v941_v0, %s808_s27 }
  0x5a   : > { %296 = vrot.lane.b32.xlu1 %v945_v1, %s810_s29  ;;  %294 = vrot.lane.b32.xlu0 %v941_v0, %s810_s29 }
  0x5e   : > { %277 = vrot.lane.b32.xlu1 %v945_v1, %s811_s21  ;;  %275 = vrot.lane.b32.xlu0 %v941_v0, %s811_s21 }
  0x62   : > { %425 = vperm.xlu0 %703, %v272_v4  }
  0xb4   : > { %v390_v8 = vpop.permute.xlu1 %389  ;;  %v407_v9 = vpop.permute.xlu0 %406 }
  0xb8   : > { %v392_v16 = vpop.permute.xlu1 %391  ;;  %v409_v19 = vpop.permute.xlu0 %408 }
  0xb9   : > { %v395_v22 = vsel %vm393_vm0, %v392_v16, %v390_v8  ;;  %v411_v23 = vsel %vm410_vm1, %v407_v9, %v409_v19  ;;  %v412_v25 = vsel %vm410_vm1, %v409_v19, %v407_v9  ;;  %v394_v26 = vsel %vm393_vm0, %v390_v8, %v392_v16 }
  0xba   : > { %v422_v28 = vmul.f32 %v636_v14, %v412_v25  ;;  %v421_v29 = vmul.f32 %v635_v15, %v411_v23  ;;  %v405_v30 = vmul.f32 %v403_v18, %v395_v22  ;;  %v404_v34 = vmul.f32 %v399_v17, %v394_v26 }
  0xbb   : > { %v308_v8 = vrot.slane %v971_v12, %v303_v58  ;;  %v286_v9 = vsub.s32 0, %v964_v6 }
  0xbc   : > { %v375_v31 = vpop.permute.xlu1 %374  ;;  %v373_v32 = vpop.permute.xlu0 %372  ;;  %446 = vmatprep.subr.mxu0 %v422_v28 }
  0xbd   : > { %v377_v35 = vsel %vm376_vm2, %v373_v32, %v375_v31  ;;  %v378_v36 = vsel %vm376_vm2, %v375_v31, %v373_v32  ;;  %447 = vmatpush1.msra.mxu0 %v421_v29  ;;  %v287_v18 = vrot.slane %v969_v11, %v286_v9  ;;  %v291_v19 = vrot.slane %v971_v12, %v286_v9 }
  0xbe   : > { %v387_v38 = vmul.f32 %v382_v24, %v377_v35  ;;  %v388_v39 = vmul.f32 %v386_v27, %v378_v36  ;;  %448 = vmatprep.subr.mxu0 %v405_v30 }
  0xbf   : > { %449 = vmatpush1.msra.mxu0 %v404_v34 }
  0xc0   : > { %v358_v43 = vpop.permute.xlu1 %357  ;;  %v356_v44 = vpop.permute.xlu0 %355  ;;  %450 = vmatprep.subr.mxu0 %v388_v39 }
  0xc1   : > { %v360_v45 = vsel %vm359_vm3, %v356_v44, %v358_v43  ;;  %v361_v46 = vsel %vm359_vm3, %v358_v43, %v356_v44  ;;  %451 = vmatpush1.msra.mxu0 %v387_v38 }
  0xc2   : > { %v370_v49 = vmul.f32 %v365_v33, %v360_v45  ;;  %v371_v50 = vmul.f32 %v369_v40, %v361_v46 }
  0xc4   : > { %v331_v54 = vpop.permute.xlu1 %330  ;;  %v329_v55 = vpop.permute.xlu0 %328  ;;  %452 = vmatprep.subr.mxu0 %v371_v50 }
  0xc5   : > { %v333_v56 = vsel %vm332_vm4, %v329_v55, %v331_v54  ;;  %v334_v57 = vsel %vm332_vm4, %v331_v54, %v329_v55  ;;  %453 = vmatpush1.msra.mxu0 %v370_v49 }
  0xc6   : > { %v343_v59 = vmul.f32 %v338_v47, %v334_v57  ;;  %v344_v60 = vmul.f32 %v342_v48, %v333_v56  ;;  %454 = vmatprep.subr.mxu0 %v354_v51 }
  0xc7   : > { %455 = vmatpush1.msra.mxu0 %v353_v53 }
  0xc8   : > { %v314_v63 = vpop.permute.xlu1 %313  ;;  %v312_v0 = vpop.permute.xlu0 %311  ;;  %456 = vmatprep.subr.mxu0 %v344_v60 }
  0xc9   : > { %v316_v1 = vsel %vm315_vm5, %v312_v0, %v314_v63  ;;  %v317_v2 = vsel %vm315_vm5, %v314_v63, %v312_v0  ;;  %457 = vmatpush1.msra.mxu0 %v343_v59 }
  0xca   : > { %v326_v4 = vmul.f32 %v321_v61, %v317_v2  ;;  %v327_v5 = vmul.f32 %v325_v62, %v316_v1 }
  0xcc   : > { %v297_v10 = vpop.permute.xlu1 %296  ;;  %v295_v13 = vpop.permute.xlu0 %294  ;;  %458 = vmatprep.subr.mxu0 %v327_v5 }
  0xcd   : > { %v299_v14 = vsel %vm298_vm6, %v295_v13, %v297_v10  ;;  %v300_v15 = vsel %vm298_vm6, %v297_v10, %v295_v13  ;;  %459 = vmatpush1.msra.mxu0 %v326_v4 }
  0xce   : > { %v309_v16 = vmul.f32 %v304_v3, %v300_v15  ;;  %v310_v17 = vmul.f32 %v308_v8, %v299_v14 }
  0xd0   : > { %v278_v20 = vpop.permute.xlu1 %277  ;;  %v276_v21 = vpop.permute.xlu0 %275  ;;  %460 = vmatprep.subr.mxu0 %v310_v17 }
  0xd1   : > { %v282_v22 = vsel %vm281_vm7, %v276_v21, %v278_v20  ;;  %v283_v23 = vsel %vm281_vm7, %v278_v20, %v276_v21  ;;  %461 = vmatpush1.msra.mxu0 %v309_v16 }
  0xd2   : > { %v292_v6 = vmul.f32 %v287_v18, %v283_v23  ;;  %v293_v24 = vmul.f32 %v291_v19, %v282_v22 }
  0xd4   : > { %462 = vmatprep.subr.mxu0 %v293_v24 }
  0xd5   : > { %463 = vmatpush1.msra.mxu0 %v292_v6 }
  0xd6   : > { %637 = vmatmul.mubr.msk.f32.vlgmr.msra.gmra.mxu0 %vm428_vm8, %v271_v7 }
  0xdd   : > { %v426_v11 = vpop.permute.xlu0 %425 }
 0x196   : > { %v498_v12 = vpop.f32.mrf.mxu0 }
 0x197   : > { %v499_v26 = vadd.f32 %v498_v12, %v426_v11 }
 0x198   : > { %v500_v25 = vpop.f32.mrf.mxu0 }
 0x199   : > { %v501_v27 = vadd.f32 %v500_v25, %v426_v11 }
 0x19b   : > { %v503_v28 = vadd.f32 %v501_v27, %v499_v26 }
 0x19d   : > { %504 = vadd.xlane.f32.xlu1 %v503_v28 }
 0x226   : > { %v505_v29 = vpop.xlane.xlu1 %504 }
 0x227   : > { %v506_v30 = vmul.f32 0.00390625, %v505_v29 }
 0x229   : > { %v507_v31 = vsub.f32 %v499_v26, %v506_v30  ;;  %v508_v32 = vsub.f32 %v501_v27, %v506_v30  ;;  %510 = vst.msk [vmem:[%s262_s13] sm:$0xff] %vm509_vm9, %v506_v30 }
 0x22b   : > { %v511_v33 = vmul.f32 %v507_v31, %v507_v31  ;;  %v512_v34 = vmul.f32 %v508_v32, %v508_v32 }
 0x22d   : > { %v513_v35 = vadd.f32 %v512_v34, %v511_v33 }
 0x22f   : > { %514 = vadd.xlane.f32.xlu0 %v513_v35 }
 0x2b8   : > { %v515_v36 = vpop.xlane.xlu0 %514 }
 0x2b9   : > { %516 = vst.msk [vmem:[%s266_s16] sm:$0xff] %vm509_vm9, %v515_v36 }
 0x2ba PF: > { %p17_p7 = scmp.ge.s32.totalorder %s886_s28, 4   ;;  %s1055_s18 = smov %s788_s19 }
 0x2bb   : > { %s1056_s19 = smov %s792_s20  ;;  %s1057_s20 = smov %s903_s11 }
 0x2bc   : > { %s1058_s21 = smov %s886_s28  ;;  %19 = sbr.rel (!%p17_p7) target bundleno = 4 (0x4), region = 92 }
 0x2c1   :  { %550 = vsyncpa [#allocation3], 1 }
 0x2c2   :  { %552 = vsyncpa [#allocation3 + $0x1], 1 }
 0x2c3   :  { %553 = vsyncpa [#allocation5], 1 }

</bundles_post_ra>
